<compile_context>
chip_gen: v5e
topology: v5e:2x2
jax: 0.10.0
libtpu: 0.0.40
codegen_flags: <defaults>
</compile_context>

<pallas_src>
import functools

import jax
import jax.numpy as jnp
import numpy as np
from jax import lax
from jax.experimental import pallas as pl
from jax.experimental.pallas import tpu as pltpu


def _round_up(x, m):
    return ((x + m - 1) // m) * m


def _loss_kernel(meta_ref, cox_ref, *refs, n_mod, trade_off, margin, mode):
    """
    meta_ref : SMEM int32 (2,)     -> [valid_B, valid_P]
    cox_ref  : VMEM f32 (3, R, 128)-> [true-class log-prob, hazard (time desc), event]
    refs     : n_mod x (D, TP) r1 tiles, n_mod x (D, TP) r2 tiles, out_ref (1, 1)
    """
    f32 = jnp.float32
    r1_refs = refs[:n_mod]
    r2_refs = refs[n_mod:2 * n_mod]
    out_ref = refs[2 * n_mod]

    pid = pl.program_id(0)
    valid_b = meta_ref[0]
    valid_p = meta_ref[1]

    # ------- grid step 0: cross-entropy + Cox partial likelihood (init accumulator) ---
    @pl.when(pid == 0)
    def _():
        _, R, C = cox_ref.shape                      # C == 128
        ridx = lax.broadcasted_iota(jnp.int32, (R, C), 0)
        cidx = lax.broadcasted_iota(jnp.int32, (R, C), 1)
        valid = (ridx * C + cidx) < valid_b

        lp = cox_ref[0]                              # (R, 128) true-class log-prob (0-padded)
        risk = cox_ref[1]                            # (R, 128) hazard, time-descending
        ev = cox_ref[2]                              # (R, 128) event indicator

        # --- Cox: log(cumsum(exp(risk)) + 1e-6), max-stabilised two-level prefix sum ---
        mx = jnp.max(jnp.where(valid, risk, -jnp.inf))
        hr = jnp.where(valid, jnp.exp(risk - mx), 0.0)

        tri = (lax.broadcasted_iota(jnp.int32, (C, C), 0)
               <= lax.broadcasted_iota(jnp.int32, (C, C), 1)).astype(f32)
        csum = jnp.dot(hr, tri, preferred_element_type=f32,
                       precision=jax.lax.Precision.HIGHEST)        # intra-block prefix
        if R > 1:
            # inter-block carry: total of all previous 128-blocks, per row
            low = (lax.broadcasted_iota(jnp.int32, (R, R), 1)
                   < lax.broadcasted_iota(jnp.int32, (R, R), 0)).astype(f32)
            carry = jnp.sum(jnp.dot(low, hr, preferred_element_type=f32,
                                    precision=jax.lax.Precision.HIGHEST),
                            axis=1, keepdims=True)                  # (R, 1)
            csum = csum + carry

        # log(cumsum + 1e-6) = logaddexp(mx + log(csum_shifted), log(1e-6))  (stable)
        a = mx + jnp.log(csum)
        b = float(np.log(1e-6))
        hi = jnp.maximum(a, b)
        lo = jnp.minimum(a, b)
        log_risk = hi + jnp.log(1.0 + jnp.exp(lo - hi))

        censored = jnp.where(valid, (risk - log_risk) * ev, 0.0)
        num_obs = jnp.sum(jnp.where(valid, ev, 0.0)) + 1e-6
        cox = -jnp.sum(censored) / num_obs

        if mode == 'total':
            nll = -jnp.sum(lp) / valid_b.astype(f32)    # F.nll_loss (mean over batch)
            base = nll + cox
        else:                                           # 'only_cox'
            base = cox
        out_ref[...] = jnp.broadcast_to(base, (1, 1)).astype(f32)

    # ------- every grid step: contrastive similarity over this tile of pairs ----------
    if mode == 'total':
        eps = 1e-8
        TP = r1_refs[0].shape[1]
        lane_p = lax.broadcasted_iota(jnp.int32, (1, TP), 1)
        pair_valid = (pid * TP + lane_p) < valid_p

        def normalize(ref):                             # (D, TP): pairs on lanes
            r = ref[...]
            nsq = jnp.sum(r * r, axis=0, keepdims=True)
            return r * lax.rsqrt(jnp.maximum(nsq, eps * eps))

        n1 = [normalize(r) for r in r1_refs]
        n2 = [normalize(r) for r in r2_refs]

        # cross-sample cosine summed over modalities -> (1, TP)
        dis_xy = sum(jnp.sum(a * b, axis=0, keepdims=True) for a, b in zip(n1, n2))

        if n_mod > 1:
            def pair_sum(ns):
                # sum_{i<j} n_i.n_j = 0.5 * (||sum_i n_i||^2 - sum_i ||n_i||^2)
                s = sum(ns)
                tot = jnp.sum(s * s, axis=0, keepdims=True)
                self_ = sum(jnp.sum(x * x, axis=0, keepdims=True) for x in ns)
                return 0.5 * (tot - self_)
            arg = margin + dis_xy - 0.5 * pair_sum(n1) - 0.5 * pair_sum(n2)
        else:
            arg = margin + dis_xy

        con = jnp.where(pair_valid, jnp.square(jnp.maximum(arg, 0.0)), 0.0)
        out_ref[...] = out_ref[...] + trade_off * (jnp.sum(con) / valid_p.astype(f32))


def multimodal_survival_loss(representation, modalities, pred_hazard, event, time,
                             match_key, trade_off=0.3, mode='total', pair_tile=512):
    """JAX glue (sort, pair matching, tiny gathers, lane packing) + one Pallas kernel.

    `match_key` deterministically replaces random.shuffle in _random_match.
    `pair_tile` (multiple of 128) bounds VMEM use of the contrastive operands.
    """
    modalities = list(modalities)
    M = len(modalities)
    B, D = representation[modalities[0]].shape

    score = pred_hazard['score'].astype(jnp.float32)               # (B, C) log-probs
    hazard = pred_hazard['hazard'].reshape(B).astype(jnp.float32)
    event_i32 = event.astype(jnp.int32)

    # torch.sort(time, descending=True) -- plain JAX (no Pallas sort).
    # TODO(synk): tie-breaking may differ from torch's (unstable) descending sort.
    order = jnp.argsort(-time.astype(jnp.float32))
    hazard_sorted = hazard[order]
    event_sorted = event_i32[order].astype(jnp.float32)
    # F.nll_loss only needs the true-class log-prob: gather it here (lane-dense row).
    lp = jnp.take_along_axis(score, event_i32[:, None], axis=1)[:, 0]

    L = _round_up(max(B, 1), 128)
    R = L // 128

    def _row(v):
        return jnp.pad(v.astype(jnp.float32), (0, L - B)).reshape(R, 128)

    cox_pack = jnp.stack([_row(lp), _row(hazard_sorted), _row(event_sorted)], axis=0)

    # _random_match: deterministic permutation split (replaces python random.shuffle).
    perm = jax.random.permutation(match_key, B)
    split = int(B * 0.5)
    x1, x2 = perm[:split], perm[split:]
    if int(x1.shape[0]) != int(x2.shape[0]):
        x1 = jnp.concatenate([x1, x2[:1]])
    P = int(x1.shape[0])

    TP = min(int(pair_tile), _round_up(P, 128))
    Pp = _round_up(P, TP)
    n_p_tiles = Pp // TP

    # Per-modality matched rows, lane-dense in P: (D, Pp). Gathered straight from each
    # representation (no (M, B, D) stack, no second HBM round trip).
    # TODO(synk): a fully fused in-kernel gather (scalar-prefetched x1/x2 with Element
    # row index_maps) forces a one-row-per-grid-step layout, which conflicts with the
    # lane-dense P tiling; the wrapper gather feeds the kernel HBM->VMEM exactly once.
    r1_list, r2_list = [], []
    for m in modalities:
        rep = representation[m].astype(jnp.float32)                 # (B, D)
        r1_list.append(jnp.pad(rep[x1].T, ((0, 0), (0, Pp - P))))
        r2_list.append(jnp.pad(rep[x2].T, ((0, 0), (0, Pp - P))))

    meta = jnp.array([B, P], dtype=jnp.int32)                       # runtime SMEM scalars

    kernel = functools.partial(_loss_kernel, n_mod=M, trade_off=float(trade_off),
                               margin=0.2, mode=mode)

    rep_spec = pl.BlockSpec((D, TP), lambda p: (0, p))
    out = pl.pallas_call(
        kernel,
        grid=(n_p_tiles,),
        out_shape=jax.ShapeDtypeStruct((1, 1), jnp.float32),
        in_specs=([pl.BlockSpec(memory_space=pltpu.MemorySpace.SMEM),
                   pl.BlockSpec((3, R, 128), lambda p: (0, 0, 0))]
                  + [rep_spec] * (2 * M)),
        # Scalar accumulator kept resident in VMEM across the pair-tile grid.
        # (The P axis is "arbitrary" because of the shared accumulator; a per-tile
        #  partial-sum output would be needed to shard it across v7x's two cores.)
        out_specs=pl.BlockSpec((1, 1), lambda p: (0, 0)),
        compiler_params=pltpu.CompilerParams(
            dimension_semantics=("arbitrary",),
            vmem_limit_bytes=32 * 1024 * 1024),
    )(meta, cox_pack, *r1_list, *r2_list)
    return out[0, 0]


def _reference_loss(representation, modalities, pred_hazard, event, time, match_key,
                    trade_off=0.3, mode='total'):
    """Vectorised pure-JAX reference mirroring the PyTorch forward (independent math,
    same deterministic pair matching as the Pallas wrapper)."""
    score = pred_hazard['score'].astype(jnp.float32)
    B = score.shape[0]
    event = event.astype(jnp.int32)

    order = jnp.argsort(-time.astype(jnp.float32))
    ev = event[order].astype(jnp.float32)
    risk = pred_hazard['hazard'].reshape(B).astype(jnp.float32)[order]
    log_risk = jnp.log(jnp.cumsum(jnp.exp(risk)) + 1e-6)
    cox = -jnp.sum((risk - log_risk) * ev) / (jnp.sum(ev) + 1e-6)
    if mode != 'total':
        return cox

    nll = -jnp.mean(jnp.take_along_axis(score, event[:, None], axis=1))

    perm = jax.random.permutation(match_key, B)
    split = int(B * 0.5)
    x1, x2 = perm[:split], perm[split:]
    if int(x1.shape[0]) != int(x2.shape[0]):
        x1 = jnp.concatenate([x1, x2[:1]])
    P = int(x1.shape[0])

    def unit(v):
        n = jnp.linalg.norm(v, axis=-1, keepdims=True)
        return v / jnp.maximum(n, 1e-8)

    M = len(modalities)
    margin = 0.2
    n1 = [unit(representation[m].astype(jnp.float32)[x1]) for m in modalities]
    n2 = [unit(representation[m].astype(jnp.float32)[x2]) for m in modalities]
    dxy = sum(jnp.sum(a * b, axis=-1) for a, b in zip(n1, n2))
    if M > 1:
        dxx = sum(jnp.sum(n1[i] * n1[j], axis=-1)
                  for i in range(M - 1) for j in range(i + 1, M))
        dyy = sum(jnp.sum(n2[i] * n2[j], axis=-1)
                  for i in range(M - 1) for j in range(i + 1, M))
        arg = margin + dxy - 0.5 * dxx - 0.5 * dyy
    else:
        arg = margin + dxy
    sim = jnp.sum(jnp.maximum(arg, 0.0) ** 2) / P
    return nll + cox + trade_off * sim


if __name__ == "__main__":
    def _run_case(case_key, B, D, C, modalities, pair_tile):
        ks = jax.random.split(case_key, len(modalities) + 5)
        representation = {m: jax.random.normal(ks[i], (B, D), jnp.float32)
                          for i, m in enumerate(modalities)}
        k_logit, k_haz, k_ev, k_t, k_match = ks[len(modalities):]
        pred_hazard = {
            'score': jax.nn.log_softmax(
                jax.random.normal(k_logit, (B, C), jnp.float32), axis=-1),
            'hazard': jax.random.normal(k_haz, (B, 1), jnp.float32),
        }
        event = jax.random.bernoulli(k_ev, 0.6, (B,)).astype(jnp.int32)
        time = jax.random.uniform(k_t, (B,), jnp.float32, 0.1, 10.0)

        loss = multimodal_survival_loss(representation, modalities, pred_hazard,
                                        event, time, k_match, trade_off=0.3,
                                        mode='total', pair_tile=pair_tile)
        loss = jax.block_until_ready(loss)
        ref = _reference_loss(representation, modalities, pred_hazard, event, time,
                              k_match, trade_off=0.3)
        np.testing.assert_allclose(np.asarray(loss), np.asarray(ref),
                                   rtol=2e-3, atol=2e-3)

    root = jax.random.PRNGKey(0)
    k_small, k_large = jax.random.split(root)
    # Small case matching the module's typical shapes.
    _run_case(k_small, B=8, D=32, C=2, modalities=['rna', 'image'], pair_tile=512)
    # Larger case: multi-block Cox carry (L=384, R=3) and two contrastive pair tiles.
    _run_case(k_large, B=300, D=48, C=4, modalities=['rna', 'image', 'clinical'],
              pair_tile=128)

    print("KERNEL_OK")
</pallas_src>

<mosaic_0001>
module attributes {stable_mosaic.version = 11 : i64} {
  func.func @_loss_kernel(%arg0: i32, %arg1: memref<2xi32, #tpu.memory_space<smem>>, %arg2: memref<3x1x128xf32, #tpu.memory_space<vmem>>, %arg3: memref<32x128xf32, #tpu.memory_space<vmem>>, %arg4: memref<32x128xf32, #tpu.memory_space<vmem>>, %arg5: memref<32x128xf32, #tpu.memory_space<vmem>>, %arg6: memref<32x128xf32, #tpu.memory_space<vmem>>, %arg7: memref<1x1xf32, #tpu.memory_space<vmem>>) attributes {dimension_semantics = [#tpu.dimension_semantics<arbitrary>], iteration_bounds = array<i64: 1>, scalar_prefetch = 0 : i64, scratch_operands = 0 : i64, tpu.core_type = #tpu.core_type<tc>, window_params = [{transform_indices = @transform_0, window_bounds = array<i64: 2>}, {pipeline_mode = #tpu.pipeline_mode<synchronous>, transform_indices = @transform_1, window_bounds = array<i64: 3, 1, 128>}, {transform_indices = @transform_2, window_bounds = array<i64: 32, 128>}, {transform_indices = @transform_3, window_bounds = array<i64: 32, 128>}, {transform_indices = @transform_4, window_bounds = array<i64: 32, 128>}, {transform_indices = @transform_5, window_bounds = array<i64: 32, 128>}, {pipeline_mode = #tpu.pipeline_mode<synchronous>, transform_indices = @transform_6, window_bounds = array<i64: 1, 1>}]} {
    %c0 = arith.constant 0 : index
    %0 = memref.load %arg1[%c0] : memref<2xi32, #tpu.memory_space<smem>>
    %c1 = arith.constant 1 : index
    %1 = memref.load %arg1[%c1] : memref<2xi32, #tpu.memory_space<smem>>
    %c0_i32 = arith.constant 0 : i32
    %2 = arith.cmpi eq, %arg0, %c0_i32 : i32
    %3 = arith.extui %2 : i1 to i32
    %c0_i32_0 = arith.constant 0 : i32
    %4 = arith.cmpi ne, %3, %c0_i32_0 : i32
    scf.if %4 {
      %116 = tpu.iota {dimensions = array<i32: 0>} : vector<1x128xi32>
      %117 = tpu.iota {dimensions = array<i32: 1>} : vector<1x128xi32>
      %c128_i32_42 = arith.constant 128 : i32
      %118 = vector.broadcast %c128_i32_42 : i32 to vector<1x128xi32>
      %119 = arith.muli %116, %118 : vector<1x128xi32>
      %120 = arith.addi %119, %117 : vector<1x128xi32>
      %121 = vector.broadcast %0 : i32 to vector<1x128xi32>
      %122 = arith.cmpi slt, %120, %121 : vector<1x128xi32>
      %c0_43 = arith.constant 0 : index
      %c0_44 = arith.constant 0 : index
      %c0_45 = arith.constant 0 : index
      %123 = vector.load %arg2[%c0_43, %c0_44, %c0_45] : memref<3x1x128xf32, #tpu.memory_space<vmem>>, vector<1x1x128xf32>
      %124 = vector.shape_cast %123 : vector<1x1x128xf32> to vector<1x128xf32>
      %c1_46 = arith.constant 1 : index
      %c0_47 = arith.constant 0 : index
      %c0_48 = arith.constant 0 : index
      %125 = vector.load %arg2[%c1_46, %c0_47, %c0_48] : memref<3x1x128xf32, #tpu.memory_space<vmem>>, vector<1x1x128xf32>
      %126 = vector.shape_cast %125 : vector<1x1x128xf32> to vector<1x128xf32>
      %c2 = arith.constant 2 : index
      %c0_49 = arith.constant 0 : index
      %c0_50 = arith.constant 0 : index
      %127 = vector.load %arg2[%c2, %c0_49, %c0_50] : memref<3x1x128xf32, #tpu.memory_space<vmem>>, vector<1x1x128xf32>
      %128 = vector.shape_cast %127 : vector<1x1x128xf32> to vector<1x128xf32>
      %cst_51 = arith.constant 0xFF800000 : f32
      %129 = vector.broadcast %cst_51 : f32 to vector<1x128xf32>
      %130 = arith.select %122, %126, %129 : vector<1x128xi1>, vector<1x128xf32>
      %131 = vector.shape_cast %130 : vector<1x128xf32> to vector<1x1x128xf32>
      %cst_52 = arith.constant dense<0xFF800000> : vector<1xf32>
      %132 = vector.multi_reduction <maximumf>, %131, %cst_52 [1, 2] : vector<1x1x128xf32> to vector<1xf32>
      %133 = vector.shape_cast %132 : vector<1xf32> to vector<1x1x1xf32>
      %134 = vector.extract %133[0, 0, 0] : f32 from vector<1x1x1xf32>
      %135 = vector.broadcast %134 : f32 to vector<1x128xf32>
      %136 = arith.subf %126, %135 : vector<1x128xf32>
      %137 = math.exp %136 : vector<1x128xf32>
      %cst_53 = arith.constant 0.000000e+00 : f32
      %138 = vector.broadcast %cst_53 : f32 to vector<1x128xf32>
      %139 = arith.select %122, %137, %138 : vector<1x128xi1>, vector<1x128xf32>
      %140 = tpu.iota {dimensions = array<i32: 0>} : vector<128x128xi32>
      %141 = tpu.iota {dimensions = array<i32: 1>} : vector<128x128xi32>
      %142 = arith.cmpi sle, %140, %141 : vector<128x128xi32>
      %143 = arith.extui %142 : vector<128x128xi1> to vector<128x128xi32>
      %144 = arith.sitofp %143 : vector<128x128xi32> to vector<128x128xf32>
      %cst_54 = arith.constant dense<0.000000e+00> : vector<1x128xf32>
      %145 = tpu.matmul %139, %144, %cst_54 {dimension_numbers = #tpu.dot_dimension_numbers<[1], [0], [0], [1], [0, 0, 1, 1], [], []>, precision = #tpu.contract_precision<fp32>} : vector<1x128xf32>, vector<128x128xf32>, vector<1x128xf32> -> vector<1x128xf32>
      %146 = math.log %145 : vector<1x128xf32>
      %147 = vector.broadcast %134 : f32 to vector<1x128xf32>
      %148 = arith.addf %147, %146 : vector<1x128xf32>
      %cst_55 = arith.constant -13.8155107 : f32
      %149 = vector.broadcast %cst_55 : f32 to vector<1x128xf32>
      %150 = arith.maximumf %148, %149 : vector<1x128xf32>
      %cst_56 = arith.constant -13.8155107 : f32
      %151 = vector.broadcast %cst_56 : f32 to vector<1x128xf32>
      %152 = arith.minimumf %148, %151 : vector<1x128xf32>
      %153 = arith.subf %152, %150 : vector<1x128xf32>
      %154 = math.exp %153 : vector<1x128xf32>
      %cst_57 = arith.constant 1.000000e+00 : f32
      %155 = vector.broadcast %cst_57 : f32 to vector<1x128xf32>
      %156 = arith.addf %155, %154 : vector<1x128xf32>
      %157 = math.log %156 : vector<1x128xf32>
      %158 = arith.addf %150, %157 : vector<1x128xf32>
      %159 = arith.subf %126, %158 : vector<1x128xf32>
      %160 = arith.mulf %159, %128 : vector<1x128xf32>
      %cst_58 = arith.constant 0.000000e+00 : f32
      %161 = vector.broadcast %cst_58 : f32 to vector<1x128xf32>
      %162 = arith.select %122, %160, %161 : vector<1x128xi1>, vector<1x128xf32>
      %cst_59 = arith.constant 0.000000e+00 : f32
      %163 = vector.broadcast %cst_59 : f32 to vector<1x128xf32>
      %164 = arith.select %122, %128, %163 : vector<1x128xi1>, vector<1x128xf32>
      %165 = vector.shape_cast %164 : vector<1x128xf32> to vector<1x1x128xf32>
      %cst_60 = arith.constant dense<0.000000e+00> : vector<1xf32>
      %166 = vector.multi_reduction <add>, %165, %cst_60 [1, 2] : vector<1x1x128xf32> to vector<1xf32>
      %167 = vector.shape_cast %166 : vector<1xf32> to vector<1x1x1xf32>
      %168 = vector.extract %167[0, 0, 0] : f32 from vector<1x1x1xf32>
      %cst_61 = arith.constant 9.99999997E-7 : f32
      %169 = arith.addf %168, %cst_61 : f32
      %170 = vector.shape_cast %162 : vector<1x128xf32> to vector<1x1x128xf32>
      %cst_62 = arith.constant dense<0.000000e+00> : vector<1xf32>
      %171 = vector.multi_reduction <add>, %170, %cst_62 [1, 2] : vector<1x1x128xf32> to vector<1xf32>
      %172 = vector.shape_cast %171 : vector<1xf32> to vector<1x1x1xf32>
      %173 = vector.extract %172[0, 0, 0] : f32 from vector<1x1x1xf32>
      %cst_63 = arith.constant 0.000000e+00 : f32
      %174 = arith.subf %cst_63, %173 : f32
      %175 = arith.divf %174, %169 : f32
      %176 = vector.shape_cast %124 : vector<1x128xf32> to vector<1x1x128xf32>
      %cst_64 = arith.constant dense<0.000000e+00> : vector<1xf32>
      %177 = vector.multi_reduction <add>, %176, %cst_64 [1, 2] : vector<1x1x128xf32> to vector<1xf32>
      %178 = vector.shape_cast %177 : vector<1xf32> to vector<1x1x1xf32>
      %179 = vector.extract %178[0, 0, 0] : f32 from vector<1x1x1xf32>
      %cst_65 = arith.constant 0.000000e+00 : f32
      %180 = arith.subf %cst_65, %179 : f32
      %181 = arith.sitofp %0 : i32 to f32
      %182 = arith.divf %180, %181 : f32
      %183 = arith.addf %182, %175 : f32
      %184 = vector.broadcast %183 : f32 to vector<1x1xf32>
      %c0_66 = arith.constant 0 : index
      %c0_67 = arith.constant 0 : index
      %185 = vector.load %arg7[%c0_66, %c0_67] : memref<1x1xf32, #tpu.memory_space<vmem>>, vector<1x1xf32>
      tpu.vector_store %arg7[%c0_66, %c0_67], %184 {strides = array<i32>} : memref<1x1xf32, #tpu.memory_space<vmem>>, vector<1x1xf32>,
    } else {
    }
    %5 = tpu.iota {dimensions = array<i32: 1>} : vector<1x128xi32>
    %c128_i32 = arith.constant 128 : i32
    %6 = arith.muli %arg0, %c128_i32 : i32
    %7 = vector.broadcast %6 : i32 to vector<1x128xi32>
    %8 = arith.addi %7, %5 : vector<1x128xi32>
    %9 = vector.broadcast %1 : i32 to vector<1x128xi32>
    %10 = arith.cmpi slt, %8, %9 : vector<1x128xi32>
    %c0_1 = arith.constant 0 : index
    %c0_2 = arith.constant 0 : index
    %11 = vector.load %arg3[%c0_1, %c0_2] : memref<32x128xf32, #tpu.memory_space<vmem>>, vector<32x128xf32>
    %12 = arith.mulf %11, %11 : vector<32x128xf32>
    %cst = arith.constant dense<0.000000e+00> : vector<128xf32>
    %13 = vector.multi_reduction <add>, %12, %cst [0] : vector<32x128xf32> to vector<128xf32>
    %14 = vector.shape_cast %13 : vector<128xf32> to vector<1x128xf32>
    %cst_3 = arith.constant 1.000000e-16 : f32
    %15 = vector.broadcast %cst_3 : f32 to vector<1x128xf32>
    %16 = arith.maximumf %14, %15 : vector<1x128xf32>
    %17 = math.rsqrt %16 : vector<1x128xf32>
    %18 = vector.broadcast %17 : vector<1x128xf32> to vector<32x128xf32>
    %19 = arith.mulf %11, %18 : vector<32x128xf32>
    %c0_4 = arith.constant 0 : index
    %c0_5 = arith.constant 0 : index
    %20 = vector.load %arg4[%c0_4, %c0_5] : memref<32x128xf32, #tpu.memory_space<vmem>>, vector<32x128xf32>
    %21 = arith.mulf %20, %20 : vector<32x128xf32>
    %cst_6 = arith.constant dense<0.000000e+00> : vector<128xf32>
    %22 = vector.multi_reduction <add>, %21, %cst_6 [0] : vector<32x128xf32> to vector<128xf32>
    %23 = vector.shape_cast %22 : vector<128xf32> to vector<1x128xf32>
    %cst_7 = arith.constant 1.000000e-16 : f32
    %24 = vector.broadcast %cst_7 : f32 to vector<1x128xf32>
    %25 = arith.maximumf %23, %24 : vector<1x128xf32>
    %26 = math.rsqrt %25 : vector<1x128xf32>
    %27 = vector.broadcast %26 : vector<1x128xf32> to vector<32x128xf32>
    %28 = arith.mulf %20, %27 : vector<32x128xf32>
    %c0_8 = arith.constant 0 : index
    %c0_9 = arith.constant 0 : index
    %29 = vector.load %arg5[%c0_8, %c0_9] : memref<32x128xf32, #tpu.memory_space<vmem>>, vector<32x128xf32>
    %30 = arith.mulf %29, %29 : vector<32x128xf32>
    %cst_10 = arith.constant dense<0.000000e+00> : vector<128xf32>
    %31 = vector.multi_reduction <add>, %30, %cst_10 [0] : vector<32x128xf32> to vector<128xf32>
    %32 = vector.shape_cast %31 : vector<128xf32> to vector<1x128xf32>
    %cst_11 = arith.constant 1.000000e-16 : f32
    %33 = vector.broadcast %cst_11 : f32 to vector<1x128xf32>
    %34 = arith.maximumf %32, %33 : vector<1x128xf32>
    %35 = math.rsqrt %34 : vector<1x128xf32>
    %36 = vector.broadcast %35 : vector<1x128xf32> to vector<32x128xf32>
    %37 = arith.mulf %29, %36 : vector<32x128xf32>
    %c0_12 = arith.constant 0 : index
    %c0_13 = arith.constant 0 : index
    %38 = vector.load %arg6[%c0_12, %c0_13] : memref<32x128xf32, #tpu.memory_space<vmem>>, vector<32x128xf32>
    %39 = arith.mulf %38, %38 : vector<32x128xf32>
    %cst_14 = arith.constant dense<0.000000e+00> : vector<128xf32>
    %40 = vector.multi_reduction <add>, %39, %cst_14 [0] : vector<32x128xf32> to vector<128xf32>
    %41 = vector.shape_cast %40 : vector<128xf32> to vector<1x128xf32>
    %cst_15 = arith.constant 1.000000e-16 : f32
    %42 = vector.broadcast %cst_15 : f32 to vector<1x128xf32>
    %43 = arith.maximumf %41, %42 : vector<1x128xf32>
    %44 = math.rsqrt %43 : vector<1x128xf32>
    %45 = vector.broadcast %44 : vector<1x128xf32> to vector<32x128xf32>
    %46 = arith.mulf %38, %45 : vector<32x128xf32>
    %47 = arith.mulf %19, %37 : vector<32x128xf32>
    %cst_16 = arith.constant dense<0.000000e+00> : vector<128xf32>
    %48 = vector.multi_reduction <add>, %47, %cst_16 [0] : vector<32x128xf32> to vector<128xf32>
    %49 = vector.shape_cast %48 : vector<128xf32> to vector<1x128xf32>
    %cst_17 = arith.constant 0.000000e+00 : f32
    %50 = vector.broadcast %cst_17 : f32 to vector<1x128xf32>
    %51 = arith.addf %50, %49 : vector<1x128xf32>
    %52 = arith.mulf %28, %46 : vector<32x128xf32>
    %cst_18 = arith.constant dense<0.000000e+00> : vector<128xf32>
    %53 = vector.multi_reduction <add>, %52, %cst_18 [0] : vector<32x128xf32> to vector<128xf32>
    %54 = vector.shape_cast %53 : vector<128xf32> to vector<1x128xf32>
    %55 = arith.addf %51, %54 : vector<1x128xf32>
    %cst_19 = arith.constant 2.000000e-01 : f32
    %56 = vector.broadcast %cst_19 : f32 to vector<1x128xf32>
    %57 = arith.addf %56, %55 : vector<1x128xf32>
    %cst_20 = arith.constant 0.000000e+00 : f32
    %58 = vector.broadcast %cst_20 : f32 to vector<32x128xf32>
    %59 = arith.addf %58, %19 : vector<32x128xf32>
    %60 = arith.addf %59, %28 : vector<32x128xf32>
    %61 = arith.mulf %60, %60 : vector<32x128xf32>
    %cst_21 = arith.constant dense<0.000000e+00> : vector<128xf32>
    %62 = vector.multi_reduction <add>, %61, %cst_21 [0] : vector<32x128xf32> to vector<128xf32>
    %63 = vector.shape_cast %62 : vector<128xf32> to vector<1x128xf32>
    %64 = arith.mulf %19, %19 : vector<32x128xf32>
    %cst_22 = arith.constant dense<0.000000e+00> : vector<128xf32>
    %65 = vector.multi_reduction <add>, %64, %cst_22 [0] : vector<32x128xf32> to vector<128xf32>
    %66 = vector.shape_cast %65 : vector<128xf32> to vector<1x128xf32>
    %cst_23 = arith.constant 0.000000e+00 : f32
    %67 = vector.broadcast %cst_23 : f32 to vector<1x128xf32>
    %68 = arith.addf %67, %66 : vector<1x128xf32>
    %69 = arith.mulf %28, %28 : vector<32x128xf32>
    %cst_24 = arith.constant dense<0.000000e+00> : vector<128xf32>
    %70 = vector.multi_reduction <add>, %69, %cst_24 [0] : vector<32x128xf32> to vector<128xf32>
    %71 = vector.shape_cast %70 : vector<128xf32> to vector<1x128xf32>
    %72 = arith.addf %68, %71 : vector<1x128xf32>
    %73 = arith.subf %63, %72 : vector<1x128xf32>
    %cst_25 = arith.constant 5.000000e-01 : f32
    %74 = vector.broadcast %cst_25 : f32 to vector<1x128xf32>
    %75 = arith.mulf %74, %73 : vector<1x128xf32>
    %cst_26 = arith.constant 5.000000e-01 : f32
    %76 = vector.broadcast %cst_26 : f32 to vector<1x128xf32>
    %77 = arith.mulf %76, %75 : vector<1x128xf32>
    %78 = arith.subf %57, %77 : vector<1x128xf32>
    %cst_27 = arith.constant 0.000000e+00 : f32
    %79 = vector.broadcast %cst_27 : f32 to vector<32x128xf32>
    %80 = arith.addf %79, %37 : vector<32x128xf32>
    %81 = arith.addf %80, %46 : vector<32x128xf32>
    %82 = arith.mulf %81, %81 : vector<32x128xf32>
    %cst_28 = arith.constant dense<0.000000e+00> : vector<128xf32>
    %83 = vector.multi_reduction <add>, %82, %cst_28 [0] : vector<32x128xf32> to vector<128xf32>
    %84 = vector.shape_cast %83 : vector<128xf32> to vector<1x128xf32>
    %85 = arith.mulf %37, %37 : vector<32x128xf32>
    %cst_29 = arith.constant dense<0.000000e+00> : vector<128xf32>
    %86 = vector.multi_reduction <add>, %85, %cst_29 [0] : vector<32x128xf32> to vector<128xf32>
    %87 = vector.shape_cast %86 : vector<128xf32> to vector<1x128xf32>
    %cst_30 = arith.constant 0.000000e+00 : f32
    %88 = vector.broadcast %cst_30 : f32 to vector<1x128xf32>
    %89 = arith.addf %88, %87 : vector<1x128xf32>
    %90 = arith.mulf %46, %46 : vector<32x128xf32>
    %cst_31 = arith.constant dense<0.000000e+00> : vector<128xf32>
    %91 = vector.multi_reduction <add>, %90, %cst_31 [0] : vector<32x128xf32> to vector<128xf32>
    %92 = vector.shape_cast %91 : vector<128xf32> to vector<1x128xf32>
    %93 = arith.addf %89, %92 : vector<1x128xf32>
    %94 = arith.subf %84, %93 : vector<1x128xf32>
    %cst_32 = arith.constant 5.000000e-01 : f32
    %95 = vector.broadcast %cst_32 : f32 to vector<1x128xf32>
    %96 = arith.mulf %95, %94 : vector<1x128xf32>
    %cst_33 = arith.constant 5.000000e-01 : f32
    %97 = vector.broadcast %cst_33 : f32 to vector<1x128xf32>
    %98 = arith.mulf %97, %96 : vector<1x128xf32>
    %99 = arith.subf %78, %98 : vector<1x128xf32>
    %cst_34 = arith.constant 0.000000e+00 : f32
    %100 = vector.broadcast %cst_34 : f32 to vector<1x128xf32>
    %101 = arith.maximumf %99, %100 : vector<1x128xf32>
    %102 = arith.mulf %101, %101 : vector<1x128xf32>
    %cst_35 = arith.constant 0.000000e+00 : f32
    %103 = vector.broadcast %cst_35 : f32 to vector<1x128xf32>
    %104 = arith.select %10, %102, %103 : vector<1x128xi1>, vector<1x128xf32>
    %c0_36 = arith.constant 0 : index
    %c0_37 = arith.constant 0 : index
    %105 = vector.load %arg7[%c0_36, %c0_37] : memref<1x1xf32, #tpu.memory_space<vmem>>, vector<1x1xf32>
    %106 = vector.shape_cast %104 : vector<1x128xf32> to vector<1x1x128xf32>
    %cst_38 = arith.constant dense<0.000000e+00> : vector<1xf32>
    %107 = vector.multi_reduction <add>, %106, %cst_38 [1, 2] : vector<1x1x128xf32> to vector<1xf32>
    %108 = vector.shape_cast %107 : vector<1xf32> to vector<1x1x1xf32>
    %109 = vector.extract %108[0, 0, 0] : f32 from vector<1x1x1xf32>
    %110 = arith.sitofp %1 : i32 to f32
    %111 = arith.divf %109, %110 : f32
    %cst_39 = arith.constant 3.000000e-01 : f32
    %112 = arith.mulf %cst_39, %111 : f32
    %113 = vector.broadcast %112 : f32 to vector<1x1xf32>
    %114 = arith.addf %105, %113 : vector<1x1xf32>
    %c0_40 = arith.constant 0 : index
    %c0_41 = arith.constant 0 : index
    %115 = vector.load %arg7[%c0_40, %c0_41] : memref<1x1xf32, #tpu.memory_space<vmem>>, vector<1x1xf32>
    tpu.vector_store %arg7[%c0_40, %c0_41], %114 {strides = array<i32>} : memref<1x1xf32, #tpu.memory_space<vmem>>, vector<1x1xf32>,
    return
  }
  func.func @transform_0(%arg0: i32) -> i32 {
    %c0_i32 = arith.constant 0 : i32
    %c0_i32_0 = arith.constant 0 : i32
    return %c0_i32 : i32
  }
  func.func @transform_1(%arg0: i32) -> (i32, i32, i32) {
    %c0_i32 = arith.constant 0 : i32
    %c0_i32_0 = arith.constant 0 : i32
    %c0_i32_1 = arith.constant 0 : i32
    %c0_i32_2 = arith.constant 0 : i32
    return %c0_i32, %c0_i32_0, %c0_i32_1 : i32, i32, i32
  }
  func.func @transform_2(%arg0: i32) -> (i32, i32) {
    %c0_i32 = arith.constant 0 : i32
    %c0_i32_0 = arith.constant 0 : i32
    return %c0_i32, %arg0 : i32, i32
  }
  func.func @transform_3(%arg0: i32) -> (i32, i32) {
    %c0_i32 = arith.constant 0 : i32
    %c0_i32_0 = arith.constant 0 : i32
    return %c0_i32, %arg0 : i32, i32
  }
  func.func @transform_4(%arg0: i32) -> (i32, i32) {
    %c0_i32 = arith.constant 0 : i32
    %c0_i32_0 = arith.constant 0 : i32
    return %c0_i32, %arg0 : i32, i32
  }
  func.func @transform_5(%arg0: i32) -> (i32, i32) {
    %c0_i32 = arith.constant 0 : i32
    %c0_i32_0 = arith.constant 0 : i32
    return %c0_i32, %arg0 : i32, i32
  }
  func.func @transform_6(%arg0: i32) -> (i32, i32) {
    %c0_i32 = arith.constant 0 : i32
    %c0_i32_0 = arith.constant 0 : i32
    %c0_i32_1 = arith.constant 0 : i32
    return %c0_i32, %c0_i32_0 : i32, i32
  }
}

</mosaic_0001>

<bundles_post_ra>
// kernel: tpu_custom_call.1
= control target key start
LH: loop header
LB: loop body
LE: loop exit
PB: predicated region body
PF: predicated region fallthrough
CT: control target
= control target key end

     0   :  { %11 = vsyncpa [#allocation5], 0  ;;  %s1997_s0 = inlined_call_operand.hbm [shape: s32[2], index: 0, kind: input, shape index: {}]   ;;  %s1998_s1 = inlined_call_operand.hbm [shape: f32[3,1,128], index: 1, kind: input, shape index: {}]   ;;  %s1999_s2 = inlined_call_operand.hbm [shape: f32[32,128], index: 2, kind: input, shape index: {}]   ;;  %s2000_s3 = inlined_call_operand.hbm [shape: f32[32,128], index: 3, kind: input, shape index: {}]   ;;  %s2001_s4 = inlined_call_operand.hbm [shape: f32[32,128], index: 4, kind: input, shape index: {}]   ;;  %s2002_s5 = inlined_call_operand.hbm [shape: f32[32,128], index: 5, kind: input, shape index: {}]   ;;  %s2003_s6 = inlined_call_operand.hbm [shape: f32[1,1], index: 6, kind: output, shape index: {}]  }
   0x1   :  { %12 = vsyncpa [#allocation3], 0 }
   0x2   :  { %13 = vsyncpa [#allocation8], 0 }
   0x3   :  { %14 = vsyncpa [#allocation11], 0  ;;  %s42_s23 = sshll.u32 %s1999_s2, 4  ;;  %s43_s23 = int_to_ptr.hbm [resolvable:$true] %s42_s23 }
   0x4   :  { %15 = vsyncpa [#allocation4], 0  ;;  %s1254_s24 = smov [#allocation7]   ;;  %s68_s28 = sshll.u32 %s2001_s4, 4  ;;  %s69_s28 = int_to_ptr.hbm [resolvable:$true] %s68_s28 }
   0x5   :  { %s44_s25 = sshll.u32 %s1254_s24, 4  ;;  %s1255_s29 = smov 128   ;;  %s45_s25 = int_to_ptr.vmem [resolvable:$true] %s44_s25 }
   0x6   :  { %s1256_s30 = smov 8   ;;  %s1257_s7 = smov [#allocation10]  }
   0x7   :  { %50 = dma.hbm_to_vmem [thread:$0]  %s43_s23, 512, %s45_s25, [#allocation8], %s1255_s29, %s1255_s29, %s1256_s30  }
   0x8   :  { %s70_s8 = sshll.u32 %s1257_s7, 4  ;;  %s21_s10 = sshll.u32 %s1997_s0, 4  ;;  %s71_s8 = int_to_ptr.vmem [resolvable:$true] %s70_s8  ;;  %s22_s10 = int_to_ptr.hbm [resolvable:$true] %s21_s10 }
   0x9   :  { %76 = dma.hbm_to_vmem [thread:$0]  %s69_s28, 512, %s71_s8, [#allocation11], %s1255_s29, %s1255_s29, %s1256_s30  }
   0xa   :  { %s29_s12 = sshll.u32 %s1998_s1, 4  ;;  %s1258_s13 = smov [#allocation2]   ;;  %s30_s12 = int_to_ptr.hbm [resolvable:$true] %s29_s12 }
   0xb   :  { %24 = dma.hbm_to_smem %s22_s10, 16, %s1258_s13, [#allocation5]  }
   0xc   :  { %s1259_s14 = smov [#allocation6]   ;;  %s1260_s16 = smov 16  }
   0xd   :  { %s31_s15 = sshll.u32 %s1259_s14, 4  ;;  %s1261_s17 = smov 1   ;;  %s32_s15 = int_to_ptr.vmem [resolvable:$true] %s31_s15 }
   0xe   :  { %37 = dma.hbm_to_vmem [thread:$0]  %s30_s12, 48, %s32_s15, [#allocation3], %s1260_s16, %s1260_s16, %s1261_s17  }
   0xf   :  { %s55_s19 = sshll.u32 %s2000_s3, 4  ;;  %s1262_s20 = smov [#allocation9]   ;;  %s56_s19 = int_to_ptr.hbm [resolvable:$true] %s55_s19 }
  0x10   :  { %s57_s21 = sshll.u32 %s1262_s20, 4  ;;  %s81_s1 = sshll.u32 %s2002_s5, 4  ;;  %s58_s21 = int_to_ptr.vmem [resolvable:$true] %s57_s21  ;;  %s82_s1 = int_to_ptr.hbm [resolvable:$true] %s81_s1 }
  0x11   :  { %63 = dma.hbm_to_vmem [thread:$0]  %s56_s19, 512, %s58_s21, [#allocation8], %s1255_s29, %s1255_s29, %s1256_s30  }
  0x12   :  { %s1263_s24 = smov [#allocation12]  }
  0x13   :  { %s83_s25 = sshll.u32 %s1263_s24, 4  ;;  %s84_s25 = int_to_ptr.vmem [resolvable:$true] %s83_s25 }
  0x14   :  { %89 = dma.hbm_to_vmem [thread:$0]  %s82_s1, 512, %s84_s25, [#allocation11], %s1255_s29, %s1255_s29, %s1256_s30  }
  0x15   :  { %1244 = dma.done.wait [#allocation5], 16  }
  0x16   :  { %1245 = vsyncadd [#allocation5], 4294967280 }
  0x17   :  { %1246 = dma.done.wait [#allocation3], 48  }
  0x18   :  { %1247 = vsyncadd [#allocation3], 4294967248 }
  0x19   :  { %1248 = dma.done.wait [#allocation8], 1024  }
  0x1a   :  { %1249 = vsyncadd [#allocation8], 4294966272 }
  0x1b   :  { %1250 = dma.done.wait [#allocation11], 1024  }
  0x1c   :  { %1251 = vsyncadd [#allocation11], 4294966272 }
  0x1d   :  { %114 = sfence }
  0x1e   :  { %s1332_s3 = sld [smem:[#allocation2]]  ;;  %v121_v0 = vlaneseq  ;;  %v1341_v6 = vld [vmem:[#allocation6 + $0x1] sm:$0x1]  ;;  %vm2004_vm0 = vcmask 1040384   ;;  %v1264_v16 = vmov 0.0   ;;  %v1265_v18 = vmov 1.0  }
  0x1f   :  { %s1961_s26 = sld [smem:[#allocation2 + $0x1]]  ;;  %s1266_s0 = smov [#allocation13]  }
  0x20   :  { %v1334_v1 = vshrl.u32 %v121_v0, 7  ;;  %v1336_v2 = vand.u32 127, %v121_v0  ;;  %s956_s18 = sshll.u32 %s1266_s0, 4  ;;  %s958_s21 = sshll.u32 %s2003_s6, 4  ;;  %s957_s18 = int_to_ptr.vmem [resolvable:$true] %s956_s18  ;;  %s959_s21 = int_to_ptr.hbm [resolvable:$true] %s958_s21 }
  0x22   :  { %v125_v3 = vmul.u32 128, %v1334_v1  ;;  %v1352_v10 = vadd.s32 120, %v1334_v1  ;;  %v1355_v11 = vadd.s32 112, %v1334_v1  ;;  %v1358_v12 = vadd.s32 104, %v1334_v1 }
  0x23   :  { %v1361_v13 = vadd.s32 96, %v1334_v1  ;;  %v1366_v14 = vadd.s32 88, %v1334_v1  ;;  %v1369_v15 = vadd.s32 80, %v1334_v1  ;;  %v1423_v28 = vadd.s32 72, %v1334_v1 }
  0x24   :  { %v126_v4 = vadd.s32 %v125_v3, %v1336_v2  ;;  %v127_v5 = vstv %s1332_s3  ;;  %vm181_vm2 = vcmp.le.s32.totalorder %v1352_v10, %v1336_v2  ;;  %vm180_vm3 = vcmp.le.s32.totalorder %v1355_v11, %v1336_v2  ;;  %v1813_v10 = vld [vmem:[#allocation6 + $0x2] sm:$0x1]  ;;  %s621_s29 = scvt.s32.f32 %s1332_s3 }
  0x25   :  { %v987_v17 = vsel %vm181_vm2, 1.0, %v1264_v16  ;;  %vm179_vm4 = vcmp.le.s32.totalorder %v1358_v12, %v1336_v2  ;;  %vm178_vm5 = vcmp.le.s32.totalorder %v1361_v13, %v1336_v2  ;;  %988 = vmatpush.msk.msra.mxu0 %vm181_vm2, %v1265_v18  ;;  %1004 = vmatpush.msk.msra.mxu3 %vm181_vm2, %v1265_v18  ;;  %v986_v20 = vsel %vm180_vm3, 1.0, %v1264_v16  ;;  %s928_s30 = scvt.s32.f32 %s1961_s26 }
  0x26   :  { %vm1343_vm1 = vcmp.lt.s32.totalorder %v126_v4, %v127_v5  ;;  %v1389_v19 = vsub.f32 %v987_v17, %v987_v17  ;;  %v985_v21 = vsel %vm179_vm4, 1.0, %v1264_v16  ;;  %v984_v22 = vsel %vm178_vm5, 1.0, %v1264_v16 }
  0x27   :  { %v134_v8 = vsel %vm1343_vm1, %v1341_v6, -inf  ;;  %v1403_v23 = vsub.f32 %v986_v20, %v986_v20  ;;  %v1405_v24 = vsub.f32 %v985_v21, %v985_v21  ;;  %v1407_v25 = vsub.f32 %v984_v22, %v984_v22  ;;  %989 = vmatpush.msk.msra.mxu0 %vm180_vm3, %v1265_v18  ;;  %1005 = vmatpush.msk.msra.mxu3 %vm180_vm3, %v1265_v18 }
  0x28   :  { %v136_v9 = vsel %vm2004_vm0, %v134_v8, -inf  ;;  %vm177_vm6 = vcmp.le.s32.totalorder %v1366_v14, %v1336_v2  ;;  %v257_v26 = vand.u32 4294901760, %v1389_v19  ;;  %vm176_vm7 = vcmp.le.s32.totalorder %v1369_v15, %v1336_v2  ;;  %358 = vmatpush.msra.mxu2 %v1389_v19 }
  0x29   :  { %137 = vmax.xlane.f32.xlu0 %v136_v9  ;;  %v983_v27 = vsel %vm177_vm6, 1.0, %v1264_v16  ;;  %v263_v29 = vand.u32 4294901760, %v1403_v23  ;;  %v269_v30 = vand.u32 4294901760, %v1405_v24  ;;  %v275_v31 = vand.u32 4294901760, %v1407_v25  ;;  %990 = vmatpush.msk.msra.mxu0 %vm179_vm4, %v1265_v18 }
  0x2a   :  { %v1433_v32 = vsub.f32 %v983_v27, %v983_v27  ;;  %v258_v33 = vsub.f32 %v1389_v19, %v257_v26  ;;  %v982_v34 = vsel %vm176_vm7, 1.0, %v1264_v16  ;;  %vm175_vm8 = vcmp.le.s32.totalorder %v1423_v28, %v1336_v2  ;;  %361 = vmatpush.msra.mxu2 %v1403_v23  ;;  %1006 = vmatpush.msk.msra.mxu3 %vm179_vm4, %v1265_v18  ;;  %v1827_v28 = vld [vmem:[#allocation7 + $0x8] sm:$0xff] }
  0x2b   :  { %v1449_v35 = vadd.s32 64, %v1334_v1  ;;  %v264_v36 = vsub.f32 %v1403_v23, %v263_v29  ;;  %v270_v37 = vsub.f32 %v1405_v24, %v269_v30  ;;  %v276_v38 = vsub.f32 %v1407_v25, %v275_v31  ;;  %991 = vmatpush.msk.msra.mxu0 %vm178_vm5, %v1265_v18 }
  0x2c   :  { %v281_v39 = vand.u32 4294901760, %v1433_v32  ;;  %v259_v40 = vand.u32 4294901760, %v258_v33  ;;  %v1470_v41 = vsub.f32 %v982_v34, %v982_v34  ;;  %v981_v42 = vsel %vm175_vm8, 1.0, %v1264_v16  ;;  %364 = vmatpush.msra.mxu2 %v1405_v24  ;;  %1007 = vmatpush.msk.msra.mxu3 %vm178_vm5, %v1265_v18 }
  0x2d   :  { %vm174_vm9 = vcmp.le.s32.totalorder %v1449_v35, %v1336_v2  ;;  %v265_v43 = vand.u32 4294901760, %v264_v36  ;;  %v271_v44 = vand.u32 4294901760, %v270_v37  ;;  %992 = vmatpush.msk.msra.mxu0 %vm177_vm6, %v1265_v18  ;;  %v1491_v47 = vsub.f32 %v981_v42, %v981_v42 }
  0x2e   :  { %v282_v45 = vsub.f32 %v1433_v32, %v281_v39  ;;  %260 = vmatpush.msra.mxu1 %v259_v40  ;;  %v287_v46 = vand.u32 4294901760, %v1470_v41  ;;  %v980_v48 = vsel %vm174_vm9, 1.0, %v1264_v16  ;;  %v1498_v49 = vadd.s32 56, %v1334_v1  ;;  %367 = vmatpush.msra.mxu2 %v1407_v25 }
  0x2f   :  { %v277_v50 = vand.u32 4294901760, %v276_v38  ;;  %v1501_v51 = vsub.f32 %v980_v48, %v980_v48  ;;  %993 = vmatpush.msk.msra.mxu0 %vm176_vm7, %v1265_v18  ;;  %v1508_v52 = vadd.s32 48, %v1334_v1  ;;  %v1511_v53 = vadd.s32 40, %v1334_v1  ;;  %1008 = vmatpush.msk.msra.mxu3 %vm177_vm6, %v1265_v18 }
  0x30   :  { %266 = vmatpush.msra.mxu1 %v265_v43  ;;  %v288_v54 = vsub.f32 %v1470_v41, %v287_v46  ;;  %v293_v55 = vand.u32 4294901760, %v1491_v47  ;;  %vm2005_vm10 = vcmp.le.s32.totalorder %v1498_v49, %v1336_v2  ;;  %v1524_v56 = vadd.s32 32, %v1334_v1  ;;  %370 = vmatpush.msra.mxu2 %v1433_v32  ;;  %v1835_v32 = vld [vmem:[#allocation9 + $0x8] sm:$0xff] }
  0x31   :  { %v299_v57 = vand.u32 4294901760, %v1501_v51  ;;  %v979_v58 = vsel %vm2005_vm10, 1.0, %v1264_v16  ;;  %vm172_vm11 = vcmp.le.s32.totalorder %v1508_v52, %v1336_v2  ;;  %994 = vmatpush.msk.msra.mxu0 %vm175_vm8, %v1265_v18  ;;  %vm171_vm12 = vcmp.le.s32.totalorder %v1511_v53, %v1336_v2  ;;  %1009 = vmatpush.msk.msra.mxu3 %vm176_vm7, %v1265_v18  ;;  %v1851_v53 = vld [vmem:[#allocation10 + $0x8] sm:$0xff] }
  0x32   :  { %272 = vmatpush.msra.mxu1 %v271_v44  ;;  %v283_v59 = vand.u32 4294901760, %v282_v45  ;;  %v294_v60 = vsub.f32 %v1491_v47, %v293_v55  ;;  %v1547_v61 = vsub.f32 %v979_v58, %v979_v58  ;;  %v978_v62 = vsel %vm172_vm11, 1.0, %v1264_v16  ;;  %373 = vmatpush.msra.mxu2 %v1470_v41  ;;  %v1841_v41 = vld [vmem:[#allocation9 + $0x10] sm:$0xff] }
  0x33   :  { %v300_v63 = vsub.f32 %v1501_v51, %v299_v57  ;;  %v1557_v0 = vsub.f32 %v978_v62, %v978_v62  ;;  %v977_v3 = vsel %vm171_vm12, 1.0, %v1264_v16  ;;  %995 = vmatpush.msk.msra.mxu0 %vm174_vm9, %v1265_v18  ;;  %vm170_vm13 = vcmp.le.s32.totalorder %v1524_v56, %v1336_v2  ;;  %1010 = vmatpush.msk.msra.mxu3 %vm175_vm8, %v1265_v18  ;;  %v1855_v56 = vld [vmem:[#allocation12] sm:$0xff] }
  0x34   :  { %278 = vmatpush.msra.mxu1 %v277_v50  ;;  %v289_v4 = vand.u32 4294901760, %v288_v54  ;;  %v305_v5 = vand.u32 4294901760, %v1547_v61  ;;  %v1574_v8 = vsub.f32 %v977_v3, %v977_v3  ;;  %v976_v9 = vsel %vm170_vm13, 1.0, %v1264_v16  ;;  %376 = vmatpush.msra.mxu2 %v1491_v47  ;;  %v1845_v47 = vld [vmem:[#allocation10] sm:$0xff] }
  0x35   :  { %v295_v17 = vand.u32 4294901760, %v294_v60  ;;  %v311_v20 = vand.u32 4294901760, %v1557_v0  ;;  %v1582_v21 = vsub.f32 %v976_v9, %v976_v9  ;;  %996 = vmatpush.msk.msra.mxu0 %vm2005_vm10, %v1265_v18  ;;  %v1589_v22 = vadd.s32 24, %v1334_v1  ;;  %1011 = vmatpush.msk.msra.mxu3 %vm174_vm9, %v1265_v18 }
  0x36   :  { %284 = vmatpush.msra.mxu1 %v283_v59  ;;  %v306_v33 = vsub.f32 %v1547_v61, %v305_v5  ;;  %v317_v34 = vand.u32 4294901760, %v1574_v8  ;;  %v1600_v36 = vadd.s32 16, %v1334_v1  ;;  %v1603_v37 = vadd.s32 8, %v1334_v1  ;;  %379 = vmatpush.msra.mxu2 %v1501_v51 }
  0x37   :  { %v301_v40 = vand.u32 4294901760, %v300_v63  ;;  %vm169_vm14 = vcmp.le.s32.totalorder %v1589_v22, %v1336_v2  ;;  %997 = vmatpush.msk.msra.mxu0 %vm172_vm11, %v1265_v18  ;;  %1012 = vmatpush.msk.msra.mxu3 %vm2005_vm10, %v1265_v18  ;;  %v312_v42 = vsub.f32 %v1557_v0, %v311_v20  ;;  %v323_v43 = vand.u32 4294901760, %v1582_v21 }
  0x38   :  { %290 = vmatpush.msra.mxu1 %v289_v4  ;;  %v975_v44 = vsel %vm169_vm14, 1.0, %v1264_v16  ;;  %vm168_vm15 = vcmp.le.s32.totalorder %v1600_v36, %v1336_v2  ;;  %382 = vmatpush.msra.mxu2 %v1547_v61  ;;  %v307_v48 = vand.u32 4294901760, %v306_v33  ;;  %v318_v54 = vsub.f32 %v1574_v8, %v317_v34  ;;  %v1859_v61 = vld [vmem:[#allocation7 + $0x18] sm:$0xff] }
  0x39   :  { %v1627_v50 = vsub.f32 %v975_v44, %v975_v44  ;;  %998 = vmatpush.msk.msra.mxu0 %vm171_vm12, %v1265_v18  ;;  %1013 = vmatpush.msk.msra.mxu3 %vm172_vm11, %v1265_v18  ;;  %v974_v58 = vsel %vm168_vm15, 1.0, %v1264_v16  ;;  %vm167_vm0 = vcmp.le.s32.totalorder %v1603_v37, %v1336_v2  ;;  %vm166_vm10 = vcmp.le.s32.totalorder %v1334_v1, %v1336_v2 }
  0x3a   :  { %296 = vmatpush.msra.mxu1 %v295_v17  ;;  %385 = vmatpush.msra.mxu2 %v1557_v0  ;;  %v1650_v62 = vsub.f32 %v974_v58, %v974_v58  ;;  %v313_v63 = vand.u32 4294901760, %v312_v42  ;;  %v324_v3 = vsub.f32 %v1582_v21, %v323_v43  ;;  %v973_v4 = vsel %vm167_vm0, 1.0, %v1264_v16  ;;  %v1861_v0 = vld [vmem:[#allocation9 + $0x18] sm:$0xff] }
  0x3b   :  { %v329_v60 = vand.u32 4294901760, %v1627_v50  ;;  %999 = vmatpush.msk.msra.mxu0 %vm170_vm13, %v1265_v18  ;;  %1014 = vmatpush.msk.msra.mxu3 %vm171_vm12, %v1265_v18  ;;  %v972_v9 = vsel %vm166_vm10, 1.0, %v1264_v16  ;;  %v1673_v33 = vsub.f32 %v973_v4, %v973_v4  ;;  %v570_v12 = vsel %vm1343_vm1, %v1813_v10, 0.0 }
  0x3c   :  { %302 = vmatpush.msra.mxu1 %v301_v40  ;;  %388 = vmatpush.msra.mxu2 %v1574_v8  ;;  %v346_v40 = vsub.f32 %v972_v9, %v972_v9  ;;  %v688_v52 = vmul.f32 %v1841_v41, %v1841_v41  ;;  %v1863_v8 = vld [vmem:[#allocation10 + $0x10] sm:$0xff]  ;;  %v689_v37 = vmul.f32 %v1861_v0, %v1861_v0 }
  0x3d   :  { %1000 = vmatpush.msk.msra.mxu0 %vm169_vm14, %v1265_v18  ;;  %1015 = vmatpush.msk.msra.mxu3 %vm170_vm13, %v1265_v18  ;;  %v330_v16 = vsub.f32 %v1627_v50, %v329_v60  ;;  %v341_v44 = vand.u32 4294901760, %v1673_v33 }
  0x3e   :  { %308 = vmatpush.msra.mxu1 %v307_v48  ;;  %391 = vmatpush.msra.mxu2 %v1582_v21  ;;  %v750_v21 = vmul.f32 %v1855_v56, %v1855_v56 }
  0x3f   :  { %1001 = vmatpush.msk.msra.mxu0 %vm168_vm15, %v1265_v18  ;;  %1016 = vmatpush.msk.msra.mxu3 %vm169_vm14, %v1265_v18 }
  0x40   :  { %314 = vmatpush.msra.mxu1 %v313_v63  ;;  %394 = vmatpush.msra.mxu2 %v1627_v50  ;;  %v342_v63 = vsub.f32 %v1673_v33, %v341_v44  ;;  %v1877_v50 = vld [vmem:[#allocation12 + $0x10] sm:$0xff] }
  0x41   :  { %1002 = vmatpush.msk.msra.mxu0 %vm167_vm0, %v1265_v18  ;;  %1017 = vmatpush.msk.msra.mxu3 %vm168_vm15, %v1265_v18 }
  0x42   :  { %397 = vmatpush.msra.mxu2 %v1650_v62 }
  0x43   :  { %1003 = vmatpush.msk.msra.mxu0 %vm166_vm10, %v1265_v18  ;;  %1018 = vmatpush.msk.msra.mxu3 %vm167_vm0, %v1265_v18 }
  0x44   :  { %400 = vmatpush.msra.mxu2 %v1673_v33  ;;  %v1881_v33 = vld [vmem:[#allocation12 + $0x18] sm:$0xff] }
  0x45   :  { %452 = vmatpush.msrb.mxu0 %v257_v26  ;;  %1019 = vmatpush.msk.msra.mxu3 %vm166_vm10, %v1265_v18 }
  0x46   :  { %403 = vmatpush.msra.mxu2 %v346_v40 }
  0x47   :  { %456 = vmatpush.msrb.mxu0 %v263_v29  ;;  %v1829_v29 = vld [vmem:[#allocation9] sm:$0xff] }
  0x48   :  { %v686_v35 = vmul.f32 %v1829_v29, %v1829_v29 }
  0x49   :  { %460 = vmatpush.msrb.mxu0 %v269_v30 }
  0x4b   :  { %464 = vmatpush.msrb.mxu0 %v275_v31  ;;  %v655_v31 = vmul.f32 %v1827_v28, %v1827_v28 }
  0x4d   :  { %468 = vmatpush.msrb.mxu0 %v281_v39  ;;  %v1839_v39 = vld [vmem:[#allocation7 + $0x10] sm:$0xff] }
  0x4f   :  { %472 = vmatpush.msrb.mxu0 %v287_v46  ;;  %v687_v46 = vmul.f32 %v1835_v32, %v1835_v32 }
  0x51   :  { %476 = vmatpush.msrb.mxu0 %v293_v55  ;;  %v718_v55 = vmul.f32 %v1845_v47, %v1845_v47 }
  0x53   :  { %480 = vmatpush.msrb.mxu0 %v299_v57  ;;  %v1857_v57 = vld [vmem:[#allocation12 + $0x8] sm:$0xff] }
  0x54   :  { %v751_v22 = vmul.f32 %v1857_v57, %v1857_v57 }
  0x55   :  { %484 = vmatpush.msrb.mxu0 %v305_v5  ;;  %v690_v5 = vadd.f32 %v687_v46, %v686_v35 }
  0x57   :  { %488 = vmatpush.msrb.mxu0 %v311_v20  ;;  %v719_v20 = vmul.f32 %v1851_v53, %v1851_v53 }
  0x59   :  { %492 = vmatpush.msrb.mxu0 %v317_v34  ;;  %v657_v34 = vmul.f32 %v1859_v61, %v1859_v61 }
  0x5b   :  { %496 = vmatpush.msrb.mxu0 %v323_v43  ;;  %v720_v43 = vmul.f32 %v1863_v8, %v1863_v8 }
  0x5d   :  { %500 = vmatpush.msrb.mxu0 %v329_v60  ;;  %v691_v60 = vadd.f32 %v690_v5, %v688_v52 }
  0x9c   :  { %v138_v27 = vpop.xlane.xlu0 %137 }
  0x9d   :  { %v139_v38 = vrot.slane %v138_v27, 4 }
  0x9f   :  { %v140_v45 = vmax.f32 %v138_v27, %v139_v38  ;;  %v335_v27 = vand.u32 4294901760, %v1650_v62  ;;  %v319_v38 = vand.u32 4294901760, %v318_v54  ;;  %v347_v54 = vand.u32 4294901760, %v346_v40 }
  0xa1   :  { %v141_v59 = vrot.slane %v140_v45, 2  ;;  %v336_v48 = vsub.f32 %v1650_v62, %v335_v27  ;;  %320 = vmatpush.msra.mxu1 %v319_v38  ;;  %v348_v4 = vsub.f32 %v346_v40, %v347_v54  ;;  %v343_v62 = vand.u32 4294901760, %v342_v63  ;;  %504 = vmatpush.msrb.mxu0 %v335_v27 }
  0xa2   :  { %v722_v27 = vadd.f32 %v719_v20, %v718_v55  ;;  %v752_v38 = vmul.f32 %v1877_v50, %v1877_v50 }
  0xa3   :  { %v142_v17 = vmax.f32 %v140_v45, %v141_v59  ;;  %v325_v45 = vand.u32 4294901760, %v324_v3  ;;  %v331_v59 = vand.u32 4294901760, %v330_v16  ;;  %v337_v3 = vand.u32 4294901760, %v336_v48  ;;  %508 = vmatpush.msrb.mxu0 %v341_v44 }
  0xa4   :  { %v349_v9 = vand.u32 4294901760, %v348_v4  ;;  %v754_v16 = vadd.f32 %v751_v22, %v750_v21  ;;  %v753_v44 = vmul.f32 %v1881_v33, %v1881_v33  ;;  %v723_v48 = vadd.f32 %v722_v27, %v720_v43 }
  0xa5   :  { %v143_v42 = vrot.slane %v142_v17, 1  ;;  %326 = vmatpush.msra.mxu1 %v325_v45  ;;  %512 = vmatpush.msrb.mxu0 %v347_v54  ;;  %v692_v45 = vadd.f32 %v691_v60, %v689_v37 }
  0xa6   :  { %v755_v54 = vadd.f32 %v754_v16, %v752_v38 }
  0xa7   :  { %v144_v58 = vmax.f32 %v142_v17, %v143_v42  ;;  %332 = vmatpush.msra.mxu1 %v331_v59  ;;  %v1879_v17 = vld [vmem:[#allocation10 + $0x18] sm:$0xff]  ;;  %v693_v59 = vrot.slane %v692_v45, 4 }
  0xa8   :  { %v721_v42 = vmul.f32 %v1879_v17, %v1879_v17 }
  0xa9   :  { %1036 = vpush %v144_v58  ;;  %338 = vmatpush.msra.mxu1 %v337_v3  ;;  %v756_v3 = vadd.f32 %v755_v54, %v753_v44 }
  0xaa   :  { %v724_v63 = vadd.f32 %v723_v48, %v721_v42 }
  0xab   :  { %344 = vmatpush.msra.mxu1 %v343_v62  ;;  %v694_v62 = vadd.f32 %v693_v59, %v692_v45 }
  0xad   :  { %350 = vmatpush.msra.mxu1 %v349_v9  ;;  %v725_v9 = vrot.slane %v724_v63, 4 }
  0xaf   :  { %1020 = vmatpush.msk.msrb.mxu1 %vm181_vm2, %v1265_v18  ;;  %vm2008_vm2 = vcmp.le.s32.totalorder %v1498_v49, %v1336_v2  ;;  %v656_v49 = vmul.f32 %v1839_v39, %v1839_v39 }
  0xb1   :  { %1021 = vmatpush.msk.msrb.mxu1 %vm180_vm3, %v1265_v18 }
  0xb3   :  { %1022 = vmatpush.msk.msrb.mxu1 %vm179_vm4, %v1265_v18 }
  0xb5   :  { %1023 = vmatpush.msk.msrb.mxu1 %vm178_vm5, %v1265_v18 }
  0xb7   :  { %1024 = vmatpush.msk.msrb.mxu1 %vm177_vm6, %v1265_v18 }
  0xb9   :  { %1025 = vmatpush.msk.msrb.mxu1 %vm176_vm7, %v1265_v18 }
  0xbb   :  { %1026 = vmatpush.msk.msrb.mxu1 %vm175_vm8, %v1265_v18 }
  0xbd   :  { %1027 = vmatpush.msk.msrb.mxu1 %vm174_vm9, %v1265_v18 }
  0xbf   :  { %1028 = vmatpush.msk.msrb.mxu1 %vm2008_vm2, %v1265_v18 }
  0xc1   :  { %1029 = vmatpush.msk.msrb.mxu1 %vm172_vm11, %v1265_v18 }
  0xc3   :  { %1030 = vmatpush.msk.msrb.mxu1 %vm171_vm12, %v1265_v18 }
  0xc5   :  { %1031 = vmatpush.msk.msrb.mxu1 %vm170_vm13, %v1265_v18 }
  0xc7   :  { %1032 = vmatpush.msk.msrb.mxu1 %vm169_vm14, %v1265_v18 }
  0xc9   :  { %1033 = vmatpush.msk.msrb.mxu1 %vm168_vm15, %v1265_v18 }
  0xcb   :  { %1034 = vmatpush.msk.msrb.mxu1 %vm167_vm0, %v1265_v18  ;;  %vm2009_vm0 = vcmask 1040384  }
  0xcc   :  { %v571_v14 = vsel %vm2009_vm0, %v570_v12, 0.0  ;;  %v757_v12 = vrot.slane %v756_v3, 4  ;;  %vm2010_vm15 = vmmov %vm2009_vm0 }
  0xcd   :  { %1035 = vmatpush.msk.msrb.mxu1 %vm166_vm10, %v1265_v18  ;;  %572 = vadd.xlane.f32.xlu0 %v571_v14  ;;  %v695_v14 = vrot.slane %v694_v62, 2 }
  0xda   :  { %s1811_s5 = spop %1036 }
  0xdb   :  { %v146_v11 = vstv %s1811_s5 }
  0xdc   :  { %v147_v13 = vsub.f32 %v1341_v6, %v146_v11  ;;  %v1825_v6 = vld [vmem:[#allocation7] sm:$0xff] }
  0xdd   :  { %v654_v30 = vmul.f32 %v1825_v6, %v1825_v6 }
  0xde   :  { %v148_v15 = vmul.f32 1.442695, %v147_v13 }
  0xdf   :  { %v658_v51 = vadd.f32 %v655_v31, %v654_v30 }
  0xe0   :  { %1065 = vpow2.f32 %v148_v15  ;;  %v726_v15 = vadd.f32 %v725_v9, %v724_v63 }
  0xe1   :  { %v659_v36 = vadd.f32 %v658_v51, %v656_v49 }
  0xe3   :  { %v660_v40 = vadd.f32 %v659_v36, %v657_v34 }
  0xe5   :  { %v661_v58 = vrot.slane %v660_v40, 4 }
  0xe6   :  { %v1066_v1 = vpop.eup %1065 }
  0xe7   :  { %v150_v18 = vsel %vm1343_vm1, %v1066_v1, 0.0  ;;  %v662_v4 = vadd.f32 %v661_v58, %v660_v40  ;;  %v758_v1 = vadd.f32 %v757_v12, %v756_v3 }
  0xe8   :  { %v246_v19 = vand.u32 4294901760, %v150_v18 }
  0xe9   :  { %v663_v13 = vrot.slane %v662_v4, 2 }
  0xea   :  { %352 = vmatmul.f32.vlgmr.msra.gmra.mxu1 %v246_v19  ;;  %v247_v23 = vsub.f32 %v150_v18, %v246_v19 }
  0xeb   :  { %v664_v18 = vadd.f32 %v663_v13, %v662_v4 }
  0xec   :  { %406 = vmatmul.f32.vlgmr.msra.gmra.mxu2 %v247_v23  ;;  %v248_v24 = vand.u32 4294901760, %v247_v23 }
  0xee   :  { %445 = vmatmul.f32.vlgmr.msra.gmra.mxu3 %v248_v24  ;;  %v249_v25 = vsub.f32 %v247_v23, %v248_v24  ;;  %v727_v23 = vrot.slane %v726_v15, 2  ;;  %v759_v24 = vrot.slane %v758_v1, 2 }
  0xf0   :  { %v250_v26 = vand.u32 4294901760, %v249_v25  ;;  %v665_v25 = vrot.slane %v664_v18, 1  ;;  %v728_v30 = vadd.f32 %v727_v23, %v726_v15  ;;  %v760_v31 = vadd.f32 %v759_v24, %v758_v1 }
  0xf2   :  { %251 = vmatmul.f32.vlgmr.msra.gmra.mxu0 %v250_v26  ;;  %551 = vmatmul.f32.vlgmr.msrb.gmra.mxu1 %v246_v19  ;;  %v666_v35 = vadd.f32 %v665_v25, %v664_v18  ;;  %v729_v49 = vrot.slane %v728_v30, 1  ;;  %v761_v51 = vrot.slane %v760_v31, 1 }
  0xf4   :  { %v667_v52 = vmax.f32 %v666_v35, 1e-16  ;;  %v730_v5 = vadd.f32 %v729_v49, %v728_v30  ;;  %v762_v20 = vadd.f32 %v761_v51, %v760_v31 }
  0xf6   :  { %1067 = vrsqrt.f32 %v667_v52  ;;  %v731_v21 = vmax.f32 %v730_v5, 1e-16  ;;  %v763_v22 = vmax.f32 %v762_v20, 1e-16  ;;  %vm674_vm3 = vweird.f32 %v667_v52 }
  0xf8   :  { %vm738_vm9 = vweird.f32 %v731_v21  ;;  %vm770_vm11 = vweird.f32 %v763_v22 }
  0xfa   :  { %514 = vmatmul.f32.vlgmr.msrb.gmra.mxu0 %v246_v19  ;;  %v696_v19 = vadd.f32 %v695_v14, %v694_v62 }
  0xfc   :  { %v697_v26 = vrot.slane %v696_v19, 1  ;;  %v1068_v34 = vpop.eup %1067 }
  0xfd   :  { %v669_v37 = vmul.f32 %v1068_v34, %v667_v52  ;;  %vm675_vm4 = vweird.f32 %v1068_v34 }
  0xfe   :  { %v698_v46 = vadd.f32 %v697_v26, %v696_v19  ;;  %vm676_vm6 = vmor %vm674_vm3, %vm675_vm4 }
  0xff   :  { %v670_v27 = vmul.f32 %v1068_v34, %v669_v37  ;;  %vm2011_vm3 = vmmov %vm2009_vm0 }
 0x100   :  { %v699_v55 = vmax.f32 %v698_v46, 1e-16 }
 0x101   :  { %v671_v42 = vmul.f32 0.5, %v670_v27 }
 0x102   :  { %1069 = vrsqrt.f32 %v699_v55  ;;  %vm706_vm5 = vweird.f32 %v699_v55 }
 0x103   :  { %1071 = vrsqrt.f32 %v731_v21  ;;  %v672_v54 = vsub.f32 1.5, %v671_v42 }
 0x104   :  { %1073 = vrsqrt.f32 %v763_v22 }
 0x105   :  { %v673_v3 = vmul.f32 %v1068_v34, %v672_v54 }
 0x107   :  { %v677_v12 = vsel %vm676_vm6, %v1068_v34, %v673_v3 }
 0x108   :  { %v1070_v36 = vpop.eup %1069  ;;  %v678_v13 = vmul.f32 %v677_v12, %v1825_v6  ;;  %v679_v14 = vmul.f32 %v677_v12, %v1827_v28  ;;  %v680_v24 = vmul.f32 %v677_v12, %v1839_v39  ;;  %v681_v49 = vmul.f32 %v677_v12, %v1859_v61 }
 0x109   :  { %v701_v43 = vmul.f32 %v1070_v36, %v699_v55  ;;  %v1072_v60 = vpop.eup %1071  ;;  %vm707_vm7 = vweird.f32 %v1070_v36 }
 0x10a   :  { %v1074_v38 = vpop.eup %1073  ;;  %v733_v40 = vmul.f32 %v1072_v60, %v731_v21  ;;  %vm708_vm8 = vmor %vm706_vm5, %vm707_vm7  ;;  %vm739_vm10 = vweird.f32 %v1072_v60  ;;  %v828_v30 = vmul.f32 %v678_v13, %v678_v13  ;;  %v829_v54 = vmul.f32 %v679_v14, %v679_v14 }
 0x10b   :  { %v702_v16 = vmul.f32 %v1070_v36, %v701_v43  ;;  %v765_v44 = vmul.f32 %v1074_v38, %v763_v22  ;;  %vm740_vm12 = vmor %vm738_vm9, %vm739_vm10  ;;  %vm771_vm13 = vweird.f32 %v1074_v38 }
 0x10c   :  { %v734_v48 = vmul.f32 %v1072_v60, %v733_v40  ;;  %vm772_vm14 = vmor %vm770_vm11, %vm771_vm13 }
 0x10d   :  { %v703_v45 = vmul.f32 0.5, %v702_v16  ;;  %v766_v58 = vmul.f32 %v1074_v38, %v765_v44 }
 0x10e   :  { %v735_v63 = vmul.f32 0.5, %v734_v48 }
 0x10f   :  { %v704_v59 = vsub.f32 1.5, %v703_v45  ;;  %v767_v9 = vmul.f32 0.5, %v766_v58 }
 0x110   :  { %v736_v62 = vsub.f32 1.5, %v735_v63  ;;  %v830_v63 = vmul.f32 %v680_v24, %v680_v24 }
 0x111   :  { %v705_v4 = vmul.f32 %v1070_v36, %v704_v59  ;;  %v768_v23 = vsub.f32 1.5, %v767_v9  ;;  %v832_v9 = vadd.f32 %v829_v54, %v828_v30 }
 0x112   :  { %v737_v1 = vmul.f32 %v1072_v60, %v736_v62  ;;  %v831_v62 = vmul.f32 %v681_v49, %v681_v49 }
 0x113   :  { %v709_v15 = vsel %vm708_vm8, %v1070_v36, %v705_v4 }
 0x114   :  { %v710_v18 = vmul.f32 %v709_v15, %v1829_v29  ;;  %v711_v19 = vmul.f32 %v709_v15, %v1835_v32  ;;  %v712_v25 = vmul.f32 %v709_v15, %v1841_v41  ;;  %v741_v26 = vsel %vm740_vm12, %v1072_v60, %v737_v1 }
 0x115   :  { %v1896_v28 = vmul.f32 %v741_v26, %v1845_v47  ;;  %v1899_v35 = vmul.f32 %v741_v26, %v1851_v53  ;;  %v769_v29 = vmul.f32 %v1074_v38, %v768_v23  ;;  %v713_v39 = vmul.f32 %v709_v15, %v1861_v0 }
 0x116   :  { %v811_v46 = vadd.f32 %v710_v18, %v678_v13  ;;  %v1904_v41 = vmul.f32 %v741_v26, %v1863_v8  ;;  %v812_v55 = vadd.f32 %v711_v19, %v679_v14  ;;  %v813_v5 = vadd.f32 %v712_v25, %v680_v24 }
 0x117   :  { %v773_v52 = vsel %vm772_vm14, %v1074_v38, %v769_v29  ;;  %v1907_v21 = vmul.f32 %v741_v26, %v1879_v17  ;;  %v778_v34 = vmul.f32 %v1896_v28, %v678_v13  ;;  %v779_v36 = vmul.f32 %v1899_v35, %v679_v14 }
 0x118   :  { %v815_v20 = vmul.f32 %v811_v46, %v811_v46  ;;  %v1910_v53 = vmul.f32 %v773_v52, %v1855_v56  ;;  %v1913_v22 = vmul.f32 %v773_v52, %v1857_v57  ;;  %v1916_v0 = vmul.f32 %v773_v52, %v1877_v50 }
 0x119   :  { %v1919_v8 = vmul.f32 %v773_v52, %v1881_v33  ;;  %v780_v17 = vmul.f32 %v1904_v41, %v680_v24  ;;  %v782_v57 = vadd.f32 %v779_v36, %v778_v34  ;;  %v814_v27 = vadd.f32 %v713_v39, %v681_v49 }
 0x11a   :  { %v792_v56 = vmul.f32 %v1910_v53, %v710_v18  ;;  %v793_v43 = vmul.f32 %v1913_v22, %v711_v19  ;;  %v794_v60 = vmul.f32 %v1916_v0, %v712_v25  ;;  %v816_v50 = vmul.f32 %v812_v55, %v812_v55 }
 0x11b   :  { %v781_v38 = vmul.f32 %v1907_v21, %v681_v49  ;;  %v795_v33 = vmul.f32 %v1919_v8, %v713_v39  ;;  %v817_v40 = vmul.f32 %v813_v5, %v813_v5  ;;  %v783_v44 = vadd.f32 %v782_v57, %v780_v17 }
 0x11c   :  { %v796_v16 = vadd.f32 %v793_v43, %v792_v56  ;;  %v818_v45 = vmul.f32 %v814_v27, %v814_v27  ;;  %v819_v48 = vadd.f32 %v816_v50, %v815_v20  ;;  %v842_v12 = vmul.f32 %v710_v18, %v710_v18 }
 0x11d   :  { %v843_v15 = vmul.f32 %v711_v19, %v711_v19  ;;  %v844_v1 = vmul.f32 %v712_v25, %v712_v25  ;;  %v784_v23 = vadd.f32 %v783_v44, %v781_v38  ;;  %v845_v29 = vmul.f32 %v713_v39, %v713_v39 }
 0x11e   :  { %v797_v59 = vadd.f32 %v796_v16, %v794_v60  ;;  %v820_v4 = vadd.f32 %v819_v48, %v817_v40  ;;  %v864_v14 = vadd.f32 %v1910_v53, %v1896_v28  ;;  %v865_v24 = vadd.f32 %v1913_v22, %v1899_v35 }
 0x11f   :  { %v846_v46 = vadd.f32 %v843_v15, %v842_v12  ;;  %v866_v18 = vadd.f32 %v1916_v0, %v1904_v41  ;;  %v867_v19 = vadd.f32 %v1919_v8, %v1907_v21  ;;  %v785_v25 = vrot.slane %v784_v23, 4 }
 0x120   :  { %v798_v26 = vadd.f32 %v797_v59, %v795_v33  ;;  %v868_v52 = vmul.f32 %v864_v14, %v864_v14  ;;  %v869_v5 = vmul.f32 %v865_v24, %v865_v24  ;;  %v881_v33 = vmul.f32 %v1896_v28, %v1896_v28 }
 0x121   :  { %v847_v30 = vadd.f32 %v846_v46, %v844_v1  ;;  %v870_v20 = vmul.f32 %v866_v18, %v866_v18  ;;  %v786_v57 = vadd.f32 %v785_v25, %v784_v23  ;;  %v882_v16 = vmul.f32 %v1899_v35, %v1899_v35 }
 0x122   :  { %v799_v39 = vrot.slane %v798_v26, 4  ;;  %v872_v17 = vadd.f32 %v869_v5, %v868_v52  ;;  %v884_v28 = vmul.f32 %v1907_v21, %v1907_v21  ;;  %v897_v23 = vmul.f32 %v1916_v0, %v1916_v0 }
 0x123   :  { %v848_v55 = vadd.f32 %v847_v30, %v845_v29  ;;  %v787_v59 = vrot.slane %v786_v57, 2 }
 0x124   :  { %v800_v60 = vadd.f32 %v799_v39, %v798_v26  ;;  %v873_v50 = vadd.f32 %v872_v17, %v870_v20  ;;  %v898_v26 = vmul.f32 %v1919_v8, %v1919_v8 }
 0x125   :  { %v849_v36 = vrot.slane %v848_v55, 4 }
 0x127   :  { %v850_v27 = vadd.f32 %v849_v36, %v848_v55 }
 0x129   :  { %v851_v44 = vrot.slane %v850_v27, 2 }
 0x167   :  { %v353_v31 = vpop.f32.mrf.mxu1 }
 0x16f   :  { %v252_v6 = vpop.f32.mrf.mxu0  ;;  %v407_v51 = vpop.f32.mrf.mxu2 }
 0x170   :  { %v354_v32 = vadd.f32 %v353_v31, %v252_v6  ;;  %v552_v3 = vpop.f32.mrf.mxu1  ;;  %v821_v31 = vadd.f32 %v820_v4, %v818_v45  ;;  %v833_v6 = vadd.f32 %v832_v9, %v830_v63  ;;  %v852_v63 = vadd.f32 %v851_v44, %v850_v27 }
 0x171   :  { %v446_v61 = vpop.f32.mrf.mxu3  ;;  %v885_v4 = vadd.f32 %v882_v16, %v881_v33 }
 0x172   :  { %v408_v47 = vadd.f32 %v407_v51, %v354_v32  ;;  %v834_v32 = vadd.f32 %v833_v6, %v831_v62  ;;  %v822_v49 = vrot.slane %v821_v31, 4  ;;  %v895_v62 = vmul.f32 %v1910_v53, %v1910_v53 }
 0x173   :  { %v788_v6 = vadd.f32 %v787_v59, %v786_v57 }
 0x174   :  { %v447_v37 = vadd.f32 %v446_v61, %v408_v47  ;;  %v835_v51 = vrot.slane %v834_v32, 4  ;;  %v823_v34 = vadd.f32 %v822_v49, %v821_v31 }
 0x175   :  { %v789_v25 = vrot.slane %v788_v6, 1 }
 0x176   :  { %v836_v47 = vadd.f32 %v835_v51, %v834_v32  ;;  %v824_v40 = vrot.slane %v823_v34, 2 }
 0x177   :  { %v515_v42 = vpop.f32.mrf.mxu0 }
 0x178   :  { %v516_v58 = vadd.f32 %v515_v42, %v447_v37  ;;  %v871_v37 = vmul.f32 %v867_v19, %v867_v19  ;;  %v837_v43 = vrot.slane %v836_v47, 2  ;;  %v825_v9 = vadd.f32 %v824_v40, %v823_v34 }
 0x17a   :  { %v553_v13 = vadd.f32 %v552_v3, %v516_v58  ;;  %v838_v42 = vadd.f32 %v837_v43, %v836_v47  ;;  %v874_v45 = vadd.f32 %v873_v50, %v871_v37  ;;  %v883_v58 = vmul.f32 %v1904_v41, %v1904_v41 }
 0x17b   :  { %v896_v41 = vmul.f32 %v1913_v22, %v1913_v22  ;;  %v826_v46 = vrot.slane %v825_v9, 1  ;;  %v573_v22 = vpop.xlane.xlu0 %572  ;;  %v790_v37 = vadd.f32 %v789_v25, %v788_v6 }
 0x17c   :  { %1075 = vlog2.f32 %v553_v13  ;;  %v875_v3 = vrot.slane %v874_v45, 4  ;;  %v839_v12 = vrot.slane %v838_v42, 1  ;;  %v853_v13 = vrot.slane %v852_v63, 1 }
 0x17d   :  { %v886_v1 = vadd.f32 %v885_v4, %v883_v58  ;;  %v899_v31 = vadd.f32 %v896_v41, %v895_v62  ;;  %v574_v19 = vrot.slane %v573_v22, 4  ;;  %v827_v52 = vadd.f32 %v826_v46, %v825_v9  ;;  %v1087_v9 = vld [vmem:[#allocation6 + $0x1] sm:$0x1] }
 0x17e   :  { %v876_v21 = vadd.f32 %v875_v3, %v874_v45  ;;  %v840_v14 = vadd.f32 %v839_v12, %v838_v42  ;;  %v854_v32 = vadd.f32 %v853_v13, %v852_v63  ;;  %v622_v46 = vstv %s621_s29 }
 0x17f   :  { %v887_v53 = vadd.f32 %v886_v1, %v884_v28  ;;  %v900_v24 = vadd.f32 %v899_v31, %v897_v23  ;;  %v575_v55 = vadd.f32 %v574_v19, %v573_v22  ;;  %vm628_vm7 = vweird.f32 %v622_v46 }
 0x180   :  { %v877_v30 = vrot.slane %v876_v21, 2  ;;  %v855_v39 = vadd.f32 %v854_v32, %v840_v14  ;;  %v929_v32 = vstv %s928_s30 }
 0x181   :  { %v888_v49 = vrot.slane %v887_v53, 4  ;;  %v901_v18 = vadd.f32 %v900_v24, %v898_v26  ;;  %v576_v36 = vrot.slane %v575_v55, 2  ;;  %v648_v26 = vstv %s1961_s26 }
 0x182   :  { %v1076_v61 = vpop.eup %1075  ;;  %v856_v43 = vsub.f32 %v827_v52, %v855_v39  ;;  %vm649_vm2 = vcmp.lt.s32.totalorder %v1336_v2, %v648_v26  ;;  %vm935_vm9 = vweird.f32 %v929_v32 }
 0x183   :  { %v556_v56 = vmul.f32 0.6931472, %v1076_v61  ;;  %v889_v51 = vadd.f32 %v888_v49, %v887_v53  ;;  %v902_v8 = vrot.slane %v901_v18, 4  ;;  %v878_v61 = vadd.f32 %v877_v30, %v876_v21 }
 0x184   :  { %v857_v42 = vmul.f32 0.5, %v856_v43 }
 0x185   :  { %v1939_v38 = vadd.f32 %v556_v56, %v146_v11  ;;  %v801_v11 = vrot.slane %v800_v60, 2  ;;  %v890_v20 = vrot.slane %v889_v51, 2  ;;  %v903_v34 = vadd.f32 %v902_v8, %v901_v18 }
 0x186   :  { %v879_v50 = vrot.slane %v878_v61, 1 }
 0x187   :  { %v559_v48 = vmin.f32 %v1939_v38, -13.815511  ;;  %v558_v54 = vmax.f32 %v1939_v38, -13.815511  ;;  %v802_v29 = vadd.f32 %v801_v11, %v800_v60  ;;  %v891_v56 = vadd.f32 %v890_v20, %v889_v51 }
 0x188   :  { %v904_v57 = vrot.slane %v903_v34, 2  ;;  %v577_v60 = vadd.f32 %v576_v36, %v575_v55  ;;  %v880_v59 = vadd.f32 %v879_v50, %v878_v61 }
 0x189   :  { %v560_v35 = vsub.f32 %v559_v48, %v558_v54  ;;  %v803_v0 = vrot.slane %v802_v29, 1  ;;  %v892_v27 = vrot.slane %v891_v56, 1 }
 0x18a   :  { %v905_v33 = vadd.f32 %v904_v57, %v903_v34  ;;  %v578_v16 = vrot.slane %v577_v60, 1 }
 0x18b   :  { %v561_v15 = vmul.f32 1.442695, %v560_v35  ;;  %v804_v17 = vadd.f32 %v803_v0, %v802_v29  ;;  %v893_v44 = vadd.f32 %v892_v27, %v891_v56  ;;  %v858_v35 = vmul.f32 0.5, %v857_v42 }
 0x18c   :  { %v906_v45 = vrot.slane %v905_v33, 1  ;;  %v579_v48 = vadd.f32 %v578_v16, %v577_v60  ;;  %v634_v42 = vand.u32 2147483648, %v622_v46 }
 0x18d   :  { %1077 = vpow2.f32 %v561_v15  ;;  %v805_v40 = vadd.f32 %v804_v17, %v790_v37 }
 0x18e   :  { %v907_v11 = vadd.f32 %v906_v45, %v905_v33  ;;  %1038 = vpush %v579_v48  ;;  %v632_v45 = vand.u32 2147483647, %v622_v46 }
 0x18f   :  { %v806_v28 = vadd.f32 0.2, %v805_v40 }
 0x190   :  { %v908_v3 = vadd.f32 %v907_v11, %v893_v44  ;;  %v941_v11 = vand.u32 2147483648, %v929_v32  ;;  %vm633_vm13 = vcmp.eq.f32.partialorder %v632_v45, 8.507059e+37 }
 0x191   :  { %v859_v13 = vsub.f32 %v806_v28, %v858_v35  ;;  %v939_v35 = vand.u32 2147483647, %v929_v32 }
 0x192   :  { %v909_v62 = vsub.f32 %v880_v59, %v908_v3 }
 0x193   :  { %v1078_v5 = vpop.eup %1077  ;;  %vm940_vm14 = vcmp.eq.f32.partialorder %v939_v35, 8.507059e+37 }
 0x194   :  { %v563_v47 = vadd.f32 1.0, %v1078_v5  ;;  %v910_v41 = vmul.f32 0.5, %v909_v62 }
 0x196   :  { %1079 = vlog2.f32 %v563_v47  ;;  %v911_v1 = vmul.f32 0.5, %v910_v41 }
 0x198   :  { %v912_v31 = vsub.f32 %v859_v13, %v911_v1  ;;  %v942_v13 = vor.u32 1.1754944e-38, %v941_v11 }
 0x19a   :  { %v913_v38 = vmax.f32 %v912_v31, 0.0 }
 0x19c   :  { %v1080_v58 = vpop.eup %1079  ;;  %v914_v6 = vmul.f32 %v913_v38, %v913_v38 }
 0x19d   :  { %v565_v63 = vmul.f32 0.6931472, %v1080_v58 }
 0x19e   :  { %v915_v53 = vsel %vm649_vm2, %v914_v6, 0.0 }
 0x19f   :  { %v566_v4 = vadd.f32 %v565_v63, %v558_v54  ;;  %v129_v54 = vld [vmem:[#allocation6] sm:$0x1] }
 0x1a0   :  { %v610_v29 = vsel %vm2009_vm0, %v129_v54, 0.0 }
 0x1a1   :  { %v567_v12 = vsub.f32 %v1087_v9, %v566_v4  ;;  %v635_v4 = vor.u32 1.1754944e-38, %v634_v42 }
 0x1a3   :  { %v568_v15 = vmul.f32 %v567_v12, %v1813_v10  ;;  %v918_v10 = vsel %vm2011_vm3, %v915_v53, 0.0 }
 0x1a4   :  { %919 = vadd.xlane.f32.xlu2 %v918_v10 }
 0x1a5   :  { %v569_v23 = vsel %vm1343_vm1, %v568_v15, 0.0 }
 0x1a6   :  { %v582_v21 = vsel %vm2010_vm15, %v569_v23, 0.0  ;;  %vm641_vm15 = vcmask 0  }
 0x1a7   :  { %583 = vadd.xlane.f32.xlu1 %v582_v21 }
 0x1af   :  { %611 = vadd.xlane.f32.xlu1 %v610_v29 }
 0x1bf   :  { %s1039_s27 = spop %1038 }
 0x1c0   :  { %s581_s28 = sadd.f32 1e-06, %s1039_s27 }
 0x1c2   :  { %v593_v7 = vstv %s581_s28 }
 0x1c3   :  { %1081 = vrcp.f32 %v593_v7  ;;  %vm599_vm1 = vweird.f32 %v593_v7  ;;  %v605_v39 = vand.u32 2147483648, %v593_v7  ;;  %v603_v5 = vand.u32 2147483647, %v593_v7 }
 0x1c4   :  { %1083 = vrcp.f32 %v622_v46 }
 0x1c5   :  { %1085 = vrcp.f32 %v929_v32  ;;  %v606_v56 = vor.u32 1.1754944e-38, %v605_v39  ;;  %vm604_vm6 = vcmp.eq.f32.partialorder %v603_v5, 8.507059e+37 }
 0x1c9   :  { %v1082_v14 = vpop.eup %1081 }
 0x1ca   :  { %v595_v24 = vmul.f32 %v1082_v14, %v593_v7  ;;  %v1084_v2 = vpop.eup %1083  ;;  %vm600_vm4 = vweird.f32 %v1082_v14 }
 0x1cb   :  { %v1975_v22 = vpop.eup %1085  ;;  %v624_v30 = vmul.f32 %v1084_v2, %v622_v46  ;;  %vm1978_vm5 = vmor %vm599_vm1, %vm600_vm4  ;;  %vm629_vm8 = vweird.f32 %v1084_v2 }
 0x1cc   :  { %v596_v49 = vsub.f32 1.0, %v595_v24  ;;  %v931_v0 = vmul.f32 %v1975_v22, %v929_v32  ;;  %vm936_vm10 = vweird.f32 %v1975_v22  ;;  %vm1986_vm11 = vmor %vm628_vm7, %vm629_vm8 }
 0x1cd   :  { %v625_v52 = vsub.f32 1.0, %v624_v30  ;;  %vm937_vm12 = vmor %vm935_vm9, %vm936_vm10 }
 0x1ce   :  { %v597_v25 = vmul.f32 %v1082_v14, %v596_v49  ;;  %v932_v47 = vsub.f32 1.0, %v931_v0 }
 0x1cf   :  { %v626_v36 = vmul.f32 %v1084_v2, %v625_v52 }
 0x1d0   :  { %v598_v55 = vadd.f32 %v1082_v14, %v597_v25  ;;  %v933_v50 = vmul.f32 %v1975_v22, %v932_v47 }
 0x1d1   :  { %v627_v40 = vadd.f32 %v1084_v2, %v626_v36 }
 0x1d2   :  { %v602_v60 = vsel %vm1978_vm5, %v1082_v14, %v598_v55  ;;  %v934_v28 = vadd.f32 %v1975_v22, %v933_v50 }
 0x1d3   :  { %v607_v58 = vsel %vm604_vm6, %v606_v56, %v602_v60  ;;  %v631_v62 = vsel %vm1986_vm11, %v1084_v2, %v627_v40 }
 0x1d4   :  { %v938_v41 = vsel %vm937_vm12, %v1975_v22, %v934_v28  ;;  %v636_v1 = vsel %vm633_vm13, %v635_v4, %v631_v62 }
 0x1d5   :  { %v943_v21 = vsel %vm940_vm14, %v942_v13, %v938_v41 }
 0x217   :  { %v920_v61 = vpop.xlane.xlu2 %919 }
 0x218   :  { %v921_v17 = vrot.slane %v920_v61, 4 }
 0x21a   :  { %v584_v18 = vpop.xlane.xlu1 %583  ;;  %v922_v27 = vadd.f32 %v921_v17, %v920_v61 }
 0x21b   :  { %v585_v19 = vrot.slane %v584_v18, 4 }
 0x21c   :  { %v923_v44 = vrot.slane %v922_v27, 2 }
 0x21d   :  { %v586_v51 = vadd.f32 %v585_v19, %v584_v18 }
 0x21e   :  { %v924_v63 = vadd.f32 %v923_v44, %v922_v27 }
 0x21f   :  { %v587_v8 = vrot.slane %v586_v51, 2 }
 0x220   :  { %v925_v9 = vrot.slane %v924_v63, 1 }
 0x221   :  { %v588_v34 = vadd.f32 %v587_v8, %v586_v51 }
 0x222   :  { %v612_v37 = vpop.xlane.xlu1 %611  ;;  %v926_v23 = vadd.f32 %v925_v9, %v924_v63 }
 0x223   :  { %v613_v43 = vrot.slane %v612_v37, 4  ;;  %v589_v57 = vrot.slane %v588_v34, 1 }
 0x225   :  { %v614_v33 = vadd.f32 %v613_v43, %v612_v37  ;;  %v590_v16 = vadd.f32 %v589_v57, %v588_v34 }
 0x227   :  { %v615_v48 = vrot.slane %v614_v33, 2  ;;  %1040 = vpush %v590_v16 }
 0x228   :  { %1042 = vpush %v607_v58 }
 0x229   :  { %v616_v3 = vadd.f32 %v615_v48, %v614_v33 }
 0x22b   :  { %v617_v12 = vrot.slane %v616_v3, 1 }
 0x22d   :  { %v618_v15 = vadd.f32 %v617_v12, %v616_v3 }
 0x22f   :  { %1044 = vpush %v618_v15 }
 0x230   :  { %1046 = vpush %v636_v1 }
 0x231   :  { %1048 = vpush %v926_v23 }
 0x232   :  { %1050 = vpush %v943_v21 }
 0x258   :  { %s1041_s7 = spop %1040 }
 0x259   :  { %s592_s8 = ssub.f32 0.0, %s1041_s7  ;;  %s1043_s9 = spop %1042 }
 0x25b   :  { %s609_s11 = smul.f32 %s1043_s9, %s592_s8 }
 0x260   :  { %s1045_s2 = spop %1044 }
 0x261   :  { %s620_s10 = ssub.f32 0.0, %s1045_s2  ;;  %s1047_s4 = spop %1046 }
 0x262   :  { %s1049_s12 = spop %1048 }
 0x263   :  { %s638_s13 = smul.f32 %s1047_s4, %s620_s10  ;;  %s1051_s14 = spop %1050 }
 0x264   :  { %s945_s16 = smul.f32 %s1051_s14, %s1049_s12 }
 0x265   :  { %s639_s15 = sadd.f32 %s638_s13, %s609_s11 }
 0x266   :  { %s946_s17 = smul.f32 0.3, %s945_s16 }
 0x267   :  { %v640_v26 = vstv %s639_s15 }
 0x268   :  { %642 = vst.msk [vmem:[#allocation13] sm:$0x1] %vm641_vm15, %v640_v26  ;;  %v947_v38 = vstv %s946_s17 }
 0x26f   :  { %v916_v31 = vld [vmem:[#allocation13] sm:$0x1] }
 0x270   :  { %v948_v54 = vadd.f32 %v947_v38, %v916_v31 }
 0x272   :  { %950 = vst.msk [vmem:[#allocation13] sm:$0x1] %vm641_vm15, %v948_v54 }
 0x273   :  { %961 = dma.vmem_to_hbm [thread:$0]  %s957_s18, 16, %s959_s21, [#allocation4]  }
 0x274   :  { %1252 = dma.done.wait [#allocation4], 16  }
 0x275   :  { %1253 = vsyncadd [#allocation4], 4294967280 }
 0x276   :  { %966 = vsyncpa [#allocation3], 1 }
 0x277   :  { %967 = vsyncpa [#allocation8], 1 }
 0x278   :  { %968 = vsyncpa [#allocation11], 1 }
 0x279   :  { %969 = vsyncpa [#allocation4], 1 }
 0x27a   :  { %970 = vsyncpa [#allocation5], 1 }

</bundles_post_ra>
